<compile_context>
chip_gen: v5e
topology: v5e:2x2
jax: 0.10.0
libtpu: 0.0.40
codegen_flags: <defaults>
</compile_context>

<pallas_src>
import math
from typing import NamedTuple

import jax
import jax.numpy as jnp
from jax import lax
from jax.experimental import pallas as pl
from jax.experimental.pallas import tpu as pltpu

_INV_SQRT2 = 1.0 / math.sqrt(2.0)


# -----------------------------------------------------------------------------
# Kernel
# -----------------------------------------------------------------------------
def _geglu_kernel(x_ref, w_ref, b_ref, o_ref, acc_ref):
    """Fused GEGLU step.

    x_ref  : (tm, tk)       activation tile (compute dtype, e.g. bf16)
    w_ref  : (tk, 2*tn)     interleaved [value_j | gate_j] weight tile
    b_ref  : (1, 2*tn)      interleaved [bias_v_j | bias_g_j] tile (f32)
    o_ref  : (tm, tn)       output tile
    acc_ref: (tm, 2*tn)     f32 accumulator (bias-initialised at k == 0)
    """
    k = pl.program_id(2)

    @pl.when(k == 0)
    def _init():
        # Bias-init the accumulator: drops the (tm, 2*tn) f32 add from the epilogue.
        acc_ref[...] = jnp.broadcast_to(b_ref[...], acc_ref.shape)

    # Single native-dtype MXU matmul per step with f32 accumulation.
    acc_ref[...] += jnp.dot(x_ref[...], w_ref[...],
                            preferred_element_type=jnp.float32)

    @pl.when(k == pl.num_programs(2) - 1)
    def _finalize():
        tn = o_ref.shape[-1]
        acc = acc_ref[...]
        h = acc[:, :tn]                                       # value half (f32)
        g = acc[:, tn:]                                       # gate half  (f32)
        gelu_g = 0.5 * g * (1.0 + lax.erf(g * _INV_SQRT2))    # exact erf GELU
        o_ref[...] = (h * gelu_g).astype(o_ref.dtype)


# -----------------------------------------------------------------------------
# Helpers
# -----------------------------------------------------------------------------
def _round_up(a, b):
    return (a + b - 1) // b * b


def _pick_tile(dim, pref):
    """Largest multiple-of-128 tile <= pref that divides dim, else the full dim."""
    if dim <= pref:
        return dim
    t = (pref // 128) * 128
    while t >= 128:
        if dim % t == 0:
            return t
        t -= 128
    return dim


class _ChipConfig(NamedTuple):
    tm: int
    tn: int
    tk: int
    vmem_cap: int
    num_cores: int


def _chip_config():
    """Per-generation roofline-driven tile / VMEM preferences."""
    try:
        kind = jax.devices()[0].device_kind.lower()
    except Exception:
        kind = ""
    if "v6" in kind:
        # Most HBM-bound generation: big output tiles to raise arithmetic intensity.
        return _ChipConfig(tm=2048, tn=1024, tk=512, vmem_cap=100 << 20, num_cores=1)
    if "v5 lite" in kind or "v5lite" in kind or "v5e" in kind:
        # Already MXU-bound at 512-class tiles; raise tk to cut accumulator vst traffic.
        return _ChipConfig(tm=512, tn=512, tk=1024, vmem_cap=100 << 20, num_cores=1)
    if "7" in kind:
        # 64 MiB VMEM, 2 TensorCores: smaller enlargement + tighter VMEM cap.
        return _ChipConfig(tm=1024, tn=1024, tk=512, vmem_cap=56 << 20, num_cores=2)
    # Unknown / other generations: moderate, conservative defaults.
    return _ChipConfig(tm=1024, tn=512, tk=512, vmem_cap=64 << 20, num_cores=1)


class GEGLUParams(NamedTuple):
    w_il: jax.Array        # (dim_in_pad, 2*dim_out_pad) interleaved, compute dtype
    b_il: jax.Array        # (1, 2*dim_out_pad) interleaved bias, f32
    dim_in: int
    dim_in_pad: int
    dim_out: int
    dim_out_pad: int
    tn: int


def prepare_geglu_params(weight, bias, *, compute_dtype=jnp.bfloat16, tn=None):
    """One-time transform of PyTorch-layout nn.Linear params (outside hot path).

    weight: (2*dim_out, dim_in); bias: (2*dim_out,)
      * transpose to (dim_in, 2*dim_out)
      * zero-pad dim_out to a multiple of 128 (lane-dense output stores); for a
        large awkward dim_in, zero-pad it to a multiple of 128 as well
      * interleave value/gate columns per tn-wide output tile so the kernel
        streams ONE (tk, 2*tn) weight block and issues ONE dot per step
      * cast weights to the MXU compute dtype (bf16 default, f32 accumulation)
    """
    weight = jnp.asarray(weight)
    bias = jnp.asarray(bias)
    dim_out = weight.shape[0] // 2
    dim_in = weight.shape[1]

    cfg = _chip_config()
    dim_out_pad = max(128, _round_up(dim_out, 128))
    # Pad K only when a big awkward dim_in would otherwise force a full-extent tk.
    if dim_in > 1024 and dim_in % 128 != 0:
        dim_in_pad = _round_up(dim_in, 128)
    else:
        dim_in_pad = dim_in

    if tn is None:
        tn = _pick_tile(dim_out_pad, cfg.tn)
    assert dim_out_pad % tn == 0, "tn must divide the padded dim_out"
    nb_n = dim_out_pad // tn

    w_t = weight.T.astype(jnp.float32)                 # (dim_in, 2*dim_out)
    wv = w_t[:, :dim_out]
    wg = w_t[:, dim_out:]
    pad_k = dim_in_pad - dim_in
    pad_n = dim_out_pad - dim_out
    if pad_k or pad_n:
        wv = jnp.pad(wv, ((0, pad_k), (0, pad_n)))
        wg = jnp.pad(wg, ((0, pad_k), (0, pad_n)))

    # Interleave per tn-wide j-tile: columns [j*2tn : (j+1)*2tn] = [value_j | gate_j].
    wv_r = wv.reshape(dim_in_pad, nb_n, tn)
    wg_r = wg.reshape(dim_in_pad, nb_n, tn)
    w_il = jnp.concatenate([wv_r, wg_r], axis=2).reshape(dim_in_pad, 2 * dim_out_pad)
    w_il = w_il.astype(compute_dtype)

    bv = jnp.pad(bias[:dim_out].astype(jnp.float32), (0, pad_n)).reshape(nb_n, tn)
    bg = jnp.pad(bias[dim_out:].astype(jnp.float32), (0, pad_n)).reshape(nb_n, tn)
    b_il = jnp.concatenate([bv, bg], axis=1).reshape(1, 2 * dim_out_pad)

    return GEGLUParams(w_il, b_il, dim_in, dim_in_pad, dim_out, dim_out_pad, tn)


# -----------------------------------------------------------------------------
# Wrapper
# -----------------------------------------------------------------------------
def geglu(x, params: GEGLUParams, *, tm=None, tk=None):
    """Fused GEGLU: out = h * gelu(g) where [h | g] = x @ W.T + b (PyTorch layout).

    x: (..., dim_in); returns (..., dim_out) in x.dtype.
    """
    cfg = _chip_config()
    w_il, b_il = params.w_il, params.b_il
    dim_in, dim_in_pad = params.dim_in, params.dim_in_pad
    dim_out, dim_out_pad = params.dim_out, params.dim_out_pad
    tn = params.tn

    orig_shape = x.shape
    assert orig_shape[-1] == dim_in
    out_dtype = x.dtype

    M = 1
    for d in orig_shape[:-1]:
        M *= d
    x2d = x.reshape(M, dim_in)

    # Pin MXU operand dtypes (e.g. f32 input -> bf16 stream, f32 accumulation).
    if x2d.dtype != w_il.dtype:
        x2d = x2d.astype(w_il.dtype)
    if dim_in_pad != dim_in:
        # Rare path (large awkward dim_in); the weight's K rows are zero-padded
        # to match so the extra columns contribute exactly zero.
        x2d = jnp.pad(x2d, ((0, 0), (0, dim_in_pad - dim_in)))

    # ---- tile selection ------------------------------------------------------
    tm_pref = tm if tm is not None else cfg.tm
    tk_pref = tk if tk is not None else cfg.tk
    tk = _pick_tile(dim_in_pad, tk_pref)

    if M <= tm_pref:
        tm = M                                   # single (full-extent) M block
    else:
        tm = (tm_pref // 8) * 8                  # ragged last block handled by cdiv

    nb_n = dim_out_pad // tn
    nb_m = pl.cdiv(M, tm)
    # v7x: both TensorCores shard the "parallel" axes -> ensure >= 2 parallel
    # blocks whenever the problem allows it (a 1x1 parallel grid idles one TC).
    if cfg.num_cores > 1 and nb_m * nb_n < 2 and M >= 16:
        tm = max(8, _round_up(pl.cdiv(M, 2), 8))
        nb_m = pl.cdiv(M, tm)

    nb_k = dim_in_pad // tk
    grid = (nb_m, nb_n, nb_k)

    # ---- explicit scoped-VMEM budget (single-counted, + DMA headroom) ---------
    xb = x2d.dtype.itemsize
    wb = w_il.dtype.itemsize
    ob = jnp.dtype(out_dtype).itemsize
    vmem_need = (2 * tm * tk * xb             # x stream (double-buffered)
                 + 2 * tk * (2 * tn) * wb     # fused weight stream (double-buffered)
                 + 2 * 8 * (2 * tn) * 4       # bias stream (8-sublane padded)
                 + 2 * tm * tn * ob           # output stream (double-buffered)
                 + tm * (2 * tn) * 4)         # f32 accumulator scratch
    vmem_limit = int(min(max(vmem_need + (4 << 20), 32 << 20), cfg.vmem_cap))

    out2d = pl.pallas_call(
        _geglu_kernel,
        out_shape=jax.ShapeDtypeStruct((M, dim_out_pad), out_dtype),
        grid_spec=pltpu.PrefetchScalarGridSpec(
            num_scalar_prefetch=0,
            grid=grid,
            in_specs=[
                pl.BlockSpec((tm, tk), lambda i, j, k: (i, k)),         # x rows
                pl.BlockSpec((tk, 2 * tn), lambda i, j, k: (k, j)),     # fused W
                pl.BlockSpec((1, 2 * tn), lambda i, j, k: (0, j)),      # fused bias
            ],
            out_specs=pl.BlockSpec((tm, tn), lambda i, j, k: (i, j)),
            scratch_shapes=[pltpu.VMEM((tm, 2 * tn), jnp.float32)],     # accumulator
        ),
        compiler_params=pltpu.CompilerParams(
            dimension_semantics=("parallel", "parallel", "arbitrary"),
            vmem_limit_bytes=vmem_limit,
        ),
    )(x2d, w_il, b_il)

    if dim_out_pad != dim_out:
        out2d = out2d[:, :dim_out]
    return out2d.reshape(*orig_shape[:-1], dim_out)


# -----------------------------------------------------------------------------
# Pure-JAX reference (mirrors the PyTorch module; erf-based GELU)
# -----------------------------------------------------------------------------
def geglu_ref(x, weight, bias, *, compute_dtype=jnp.float32):
    """compute_dtype mimics the kernel's MXU operand precision (f32 accumulation)."""
    xc = x.astype(compute_dtype).astype(jnp.float32)
    wc = jnp.asarray(weight).astype(compute_dtype).astype(jnp.float32)
    proj = jnp.einsum("...d,od->...o", xc, wc,
                      preferred_element_type=jnp.float32) + bias.astype(jnp.float32)
    h, g = jnp.split(proj, 2, axis=-1)
    out = h * (0.5 * g * (1.0 + lax.erf(g * _INV_SQRT2)))
    return out.astype(x.dtype)


if __name__ == "__main__":
    key = jax.random.PRNGKey(0)

    def run_case(B, S, dim_in, dim_out, case_key):
        kx, kw, kb = jax.random.split(case_key, 3)
        x = jax.random.normal(kx, (B, S, dim_in), dtype=jnp.float32)
        bound = 1.0 / math.sqrt(dim_in)
        weight = jax.random.uniform(kw, (2 * dim_out, dim_in),
                                    minval=-bound, maxval=bound, dtype=jnp.float32)
        bias = jax.random.uniform(kb, (2 * dim_out,),
                                  minval=-bound, maxval=bound, dtype=jnp.float32)

        params = prepare_geglu_params(weight, bias)   # one-time prep (bf16 operands)
        out = geglu(x, params)
        out = jax.block_until_ready(out)

        ref = geglu_ref(x, weight, bias, compute_dtype=params.w_il.dtype)
        assert out.shape == (B, S, dim_out)
        err = float(jnp.max(jnp.abs(out - ref)))
        assert jnp.allclose(out, ref, atol=2e-3, rtol=2e-3), (
            f"mismatch B={B} S={S} dim_in={dim_in} dim_out={dim_out} max_err={err}")

    k1, k2 = jax.random.split(key)
    # lane-aligned dims: fused single weight block, ragged M (24) handled w/o padding
    run_case(2, 12, 128, 128, k1)
    # tiny non-128 dims: exercises the zero-pad -> lane-dense output path
    run_case(2, 8, 32, 32, k2)

    print("KERNEL_OK")
</pallas_src>

<mosaic_0001>
module attributes {stable_mosaic.version = 11 : i64} {
  func.func @_geglu_kernel(%arg0: i32, %arg1: i32, %arg2: i32, %arg3: memref<24x128xbf16, #tpu.memory_space<vmem>>, %arg4: memref<128x256xbf16, #tpu.memory_space<vmem>>, %arg5: memref<1x256xf32, #tpu.memory_space<vmem>>, %arg6: memref<24x128xf32, #tpu.memory_space<vmem>>, %arg7: memref<24x256xf32, #tpu.memory_space<vmem>>) attributes {dimension_semantics = [#tpu.dimension_semantics<parallel>, #tpu.dimension_semantics<parallel>, #tpu.dimension_semantics<arbitrary>], iteration_bounds = array<i64: 1, 1, 1>, scalar_prefetch = 0 : i64, scratch_operands = 1 : i64, tpu.core_type = #tpu.core_type<tc>, window_params = [{transform_indices = @transform_0, window_bounds = array<i64: 24, 128>}, {transform_indices = @transform_1, window_bounds = array<i64: 128, 256>}, {transform_indices = @transform_2, window_bounds = array<i64: 1, 256>}, {transform_indices = @transform_3, window_bounds = array<i64: 24, 128>}]} {
    %c0_i32 = arith.constant 0 : i32
    %0 = arith.cmpi eq, %arg2, %c0_i32 : i32
    %1 = arith.extui %0 : i1 to i32
    %c0_i32_0 = arith.constant 0 : i32
    %2 = arith.cmpi ne, %1, %c0_i32_0 : i32
    scf.if %2 {
      %c0_10 = arith.constant 0 : index
      %c0_11 = arith.constant 0 : index
      %12 = vector.load %arg5[%c0_10, %c0_11] : memref<1x256xf32, #tpu.memory_space<vmem>>, vector<1x256xf32>
      %13 = vector.shape_cast %12 : vector<1x256xf32> to vector<1x256xf32>
      %14 = vector.broadcast %13 : vector<1x256xf32> to vector<24x256xf32>
      %c0_12 = arith.constant 0 : index
      %c0_13 = arith.constant 0 : index
      %15 = vector.load %arg7[%c0_12, %c0_13] : memref<24x256xf32, #tpu.memory_space<vmem>>, vector<24x256xf32>
      tpu.vector_store %arg7[%c0_12, %c0_13], %14 {strides = array<i32>} : memref<24x256xf32, #tpu.memory_space<vmem>>, vector<24x256xf32>,
    } else {
    }
    %c0 = arith.constant 0 : index
    %c0_1 = arith.constant 0 : index
    %3 = vector.load %arg7[%c0, %c0_1] : memref<24x256xf32, #tpu.memory_space<vmem>>, vector<24x256xf32>
    %c0_2 = arith.constant 0 : index
    %c0_3 = arith.constant 0 : index
    %4 = vector.load %arg3[%c0_2, %c0_3] : memref<24x128xbf16, #tpu.memory_space<vmem>>, vector<24x128xbf16>
    %c0_4 = arith.constant 0 : index
    %c0_5 = arith.constant 0 : index
    %5 = vector.load %arg4[%c0_4, %c0_5] : memref<128x256xbf16, #tpu.memory_space<vmem>>, vector<128x256xbf16>
    %cst = arith.constant dense<0.000000e+00> : vector<24x256xf32>
    %6 = tpu.matmul %4, %5, %cst {dimension_numbers = #tpu.dot_dimension_numbers<[1], [0], [0], [1], [0, 0, 1, 1], [], []>} : vector<24x128xbf16>, vector<128x256xbf16>, vector<24x256xf32> -> vector<24x256xf32>
    %7 = arith.addf %3, %6 : vector<24x256xf32>
    %c0_6 = arith.constant 0 : index
    %c0_7 = arith.constant 0 : index
    %8 = vector.load %arg7[%c0_6, %c0_7] : memref<24x256xf32, #tpu.memory_space<vmem>>, vector<24x256xf32>
    tpu.vector_store %arg7[%c0_6, %c0_7], %7 {strides = array<i32>} : memref<24x256xf32, #tpu.memory_space<vmem>>, vector<24x256xf32>,
    %c0_i32_8 = arith.constant 0 : i32
    %9 = arith.cmpi eq, %arg2, %c0_i32_8 : i32
    %10 = arith.extui %9 : i1 to i32
    %c0_i32_9 = arith.constant 0 : i32
    %11 = arith.cmpi ne, %10, %c0_i32_9 : i32
    scf.if %11 {
      %c0_10 = arith.constant 0 : index
      %c0_11 = arith.constant 0 : index
      %12 = vector.load %arg7[%c0_10, %c0_11] : memref<24x256xf32, #tpu.memory_space<vmem>>, vector<24x256xf32>
      %13 = vector.extract_strided_slice %12 {offsets = [0, 0], sizes = [24, 128], strides = [1, 1]} : vector<24x256xf32> to vector<24x128xf32>
      %14 = vector.extract_strided_slice %12 {offsets = [0, 128], sizes = [24, 128], strides = [1, 1]} : vector<24x256xf32> to vector<24x128xf32>
      %cst_12 = arith.constant 5.000000e-01 : f32
      %15 = vector.broadcast %cst_12 : f32 to vector<24x128xf32>
      %16 = arith.mulf %15, %14 : vector<24x128xf32>
      %cst_13 = arith.constant 0.707106769 : f32
      %17 = vector.broadcast %cst_13 : f32 to vector<24x128xf32>
      %18 = arith.mulf %14, %17 : vector<24x128xf32>
      %19 = math.erf %18 : vector<24x128xf32>
      %cst_14 = arith.constant 1.000000e+00 : f32
      %20 = vector.broadcast %cst_14 : f32 to vector<24x128xf32>
      %21 = arith.addf %20, %19 : vector<24x128xf32>
      %22 = arith.mulf %16, %21 : vector<24x128xf32>
      %23 = arith.mulf %13, %22 : vector<24x128xf32>
      %c0_15 = arith.constant 0 : index
      %c0_16 = arith.constant 0 : index
      %24 = vector.load %arg6[%c0_15, %c0_16] : memref<24x128xf32, #tpu.memory_space<vmem>>, vector<24x128xf32>
      tpu.vector_store %arg6[%c0_15, %c0_16], %23 {strides = array<i32>} : memref<24x128xf32, #tpu.memory_space<vmem>>, vector<24x128xf32>,
    } else {
    }
    return
  }
  func.func @transform_0(%arg0: i32, %arg1: i32, %arg2: i32) -> (i32, i32) {
    %c0_i32 = arith.constant 0 : i32
    return %arg0, %arg2 : i32, i32
  }
  func.func @transform_1(%arg0: i32, %arg1: i32, %arg2: i32) -> (i32, i32) {
    %c0_i32 = arith.constant 0 : i32
    return %arg2, %arg1 : i32, i32
  }
  func.func @transform_2(%arg0: i32, %arg1: i32, %arg2: i32) -> (i32, i32) {
    %c0_i32 = arith.constant 0 : i32
    %c0_i32_0 = arith.constant 0 : i32
    return %c0_i32, %arg1 : i32, i32
  }
  func.func @transform_3(%arg0: i32, %arg1: i32, %arg2: i32) -> (i32, i32) {
    %c0_i32 = arith.constant 0 : i32
    return %arg0, %arg1 : i32, i32
  }
}

</mosaic_0001>

<bundles_post_ra>
// kernel: tpu_custom_call.1
= control target key start
LH: loop header
LB: loop body
LE: loop exit
PB: predicated region body
PF: predicated region fallthrough
CT: control target
= control target key end

     0   :  { %8 = vsyncpa [#allocation4], 0  ;;  %s730_s0 = inlined_call_operand.hbm [shape: bf16[24,128], index: 0, kind: input, shape index: {}]   ;;  %s731_s1 = inlined_call_operand.hbm [shape: bf16[128,256], index: 1, kind: input, shape index: {}]   ;;  %s732_s2 = inlined_call_operand.hbm [shape: f32[1,256], index: 2, kind: input, shape index: {}]   ;;  %s733_s3 = inlined_call_operand.hbm [shape: f32[24,128], index: 3, kind: output, shape index: {}]  }
   0x1   :  { %9 = vsyncpa [#allocation7], 0  ;;  %s28_s14 = sshll.u32 %s731_s1, 4  ;;  %s29_s14 = int_to_ptr.hbm [resolvable:$true] %s28_s14 }
   0x2   :  { %10 = vsyncpa [#allocation5], 0  ;;  %s626_s15 = smov [#allocation6]   ;;  %s15_s19 = sshll.u32 %s730_s0, 4  ;;  %s16_s19 = int_to_ptr.hbm [resolvable:$true] %s15_s19 }
   0x3   :  { %s30_s16 = sshll.u32 %s626_s15, 4  ;;  %s627_s20 = smov 128   ;;  %s31_s16 = int_to_ptr.vmem [resolvable:$true] %s30_s16 }
   0x4   :  { %s628_s21 = smov 8   ;;  %s629_s22 = smov [#allocation3]  }
   0x5   :  { %36 = dma.hbm_to_vmem [thread:$0]  %s29_s14, 2048, %s31_s16, [#allocation7], %s627_s20, %s627_s20, %s628_s21  }
   0x6   :  { %s17_s23 = sshll.u32 %s629_s22, 4  ;;  %s630_s1 = smov 64   ;;  %s18_s23 = int_to_ptr.vmem [resolvable:$true] %s17_s23 }
   0x7   :  { %s631_s24 = smov 4   ;;  %s42_s27 = sshll.u32 %s732_s2, 4  ;;  %s43_s27 = int_to_ptr.hbm [resolvable:$true] %s42_s27 }
   0x8   :  { %23 = dma.hbm_to_vmem [thread:$0]  %s16_s19, 192, %s18_s23, [#allocation4], %s630_s1, %s630_s1, %s631_s24  }
   0x9   :  { %s632_s28 = smov [#allocation8]  }
   0xa   :  { %s44_s0 = sshll.u32 %s632_s28, 4  ;;  %s45_s0 = int_to_ptr.vmem [resolvable:$true] %s44_s0 }
   0xb   :  { %47 = dma.hbm_to_vmem [thread:$0]  %s43_s27, 32, %s45_s0, [#allocation7]  }
   0xc   :  { %620 = dma.done.wait [#allocation4], 192  }
   0xd   :  { %621 = vsyncadd [#allocation4], 4294967104 }
   0xe   :  { %622 = dma.done.wait [#allocation7], 2080  }
   0xf   :  { %623 = vsyncadd [#allocation7], 4294965216  ;;  %v492_v0 = vld [vmem:[#allocation6 + $0x74] sm:$0xf]  ;;  %v470_v1 = vld [vmem:[#allocation6 + $0x78] sm:$0xf0] }
  0x10   :  { %v490_v2 = vld [vmem:[#allocation6 + $0x64] sm:$0xf]  ;;  %v473_v3 = vor.u32 %v492_v0, %v470_v1  ;;  %v462_v4 = vld [vmem:[#allocation6 + $0x68] sm:$0xf0]  ;;  %v488_v6 = vld [vmem:[#allocation6 + $0x54] sm:$0xf] }
  0x11   :  { %v465_v5 = vor.u32 %v490_v2, %v462_v4  ;;  %v454_v7 = vld [vmem:[#allocation6 + $0x58] sm:$0xf0]  ;;  %v468_v8 = vld [vmem:[#allocation6 + $0x70] sm:$0xf]  ;;  %v493_v9 = vld [vmem:[#allocation6 + $0x74] sm:$0xf0] }
  0x12   :  { %209 = vmatpush.bf16.msra.mxu1 %v473_v3  ;;  %502 = vmatpush.bf16.msra.mxu3 %v473_v3  ;;  %v460_v10 = vld [vmem:[#allocation6 + $0x60] sm:$0xf]  ;;  %v457_v11 = vor.u32 %v488_v6, %v454_v7  ;;  %v469_v12 = vor.u32 %v493_v9, %v468_v8  ;;  %v491_v13 = vld [vmem:[#allocation6 + $0x64] sm:$0xf0]  ;;  %v486_v14 = vld [vmem:[#allocation6 + $0x44] sm:$0xf] }
  0x13   :  { %v446_v15 = vld [vmem:[#allocation6 + $0x48] sm:$0xf0]  ;;  %v461_v16 = vor.u32 %v491_v13, %v460_v10  ;;  %v452_v17 = vld [vmem:[#allocation6 + $0x50] sm:$0xf]  ;;  %v489_v18 = vld [vmem:[#allocation6 + $0x54] sm:$0xf0] }
  0x14   :  { %191 = vmatpush.bf16.msra.mxu0 %v469_v12  ;;  %494 = vmatpush.bf16.msra.mxu2 %v469_v12  ;;  %v449_v19 = vor.u32 %v486_v14, %v446_v15  ;;  %v484_v20 = vld [vmem:[#allocation6 + $0x34] sm:$0xf]  ;;  %v438_v21 = vld [vmem:[#allocation6 + $0x38] sm:$0xf0]  ;;  %v453_v22 = vor.u32 %v489_v18, %v452_v17  ;;  %v444_v23 = vld [vmem:[#allocation6 + $0x40] sm:$0xf] }
  0x15   :  { %v487_v24 = vld [vmem:[#allocation6 + $0x44] sm:$0xf0]  ;;  %v441_v25 = vor.u32 %v484_v20, %v438_v21  ;;  %v482_v26 = vld [vmem:[#allocation6 + $0x24] sm:$0xf]  ;;  %v430_v27 = vld [vmem:[#allocation6 + $0x28] sm:$0xf0] }
  0x16   :  { %210 = vmatpush.bf16.msra.mxu1 %v465_v5  ;;  %503 = vmatpush.bf16.msra.mxu3 %v465_v5  ;;  %v445_v28 = vor.u32 %v487_v24, %v444_v23  ;;  %v436_v29 = vld [vmem:[#allocation6 + $0x30] sm:$0xf]  ;;  %v485_v30 = vld [vmem:[#allocation6 + $0x34] sm:$0xf0]  ;;  %v433_v31 = vor.u32 %v482_v26, %v430_v27  ;;  %v480_v32 = vld [vmem:[#allocation6 + $0x14] sm:$0xf] }
  0x17   :  { %v422_v33 = vld [vmem:[#allocation6 + $0x18] sm:$0xf0]  ;;  %v437_v34 = vor.u32 %v485_v30, %v436_v29  ;;  %v428_v35 = vld [vmem:[#allocation6 + $0x20] sm:$0xf]  ;;  %v483_v36 = vld [vmem:[#allocation6 + $0x24] sm:$0xf0] }
  0x18   :  { %192 = vmatpush.bf16.msra.mxu0 %v461_v16  ;;  %495 = vmatpush.bf16.msra.mxu2 %v461_v16  ;;  %v425_v37 = vor.u32 %v480_v32, %v422_v33  ;;  %v84_v38 = vld [vmem:[#allocation3 + $0x8] sm:$0xf]  ;;  %v478_v39 = vld [vmem:[#allocation6 + $0x4] sm:$0xf]  ;;  %v414_v40 = vld [vmem:[#allocation6 + $0x8] sm:$0xf0]  ;;  %v429_v41 = vor.u32 %v483_v36, %v428_v35 }
  0x19   :  { %v106_v42 = vunpack.c.l.b16 %v84_v38  ;;  %v420_v43 = vld [vmem:[#allocation6 + $0x10] sm:$0xf]  ;;  %v481_v44 = vld [vmem:[#allocation6 + $0x14] sm:$0xf0]  ;;  %v417_v45 = vor.u32 %v478_v39, %v414_v40  ;;  %v412_v49 = vld [vmem:[#allocation6] sm:$0xf] }
  0x1a   :  { %211 = vmatpush.bf16.msra.mxu1 %v457_v11  ;;  %504 = vmatpush.bf16.msra.mxu3 %v457_v11  ;;  %v421_v46 = vor.u32 %v481_v44, %v420_v43  ;;  %v477_v47 = vld [vmem:[#allocation3] sm:$0xff]  ;;  %v479_v50 = vld [vmem:[#allocation6 + $0x4] sm:$0xf0]  ;;  %v666_v52 = vld [vmem:[#allocation8] sm:$0x3]  ;;  %s633_s2 = smov [#allocation9]  }
  0x1b   :  { %v108_v48 = vpack.c.b16 %v106_v42, %v106_v42  ;;  %v413_v51 = vor.u32 %v479_v50, %v412_v49  ;;  %v67_v53 = vperm.slane %v666_v52, 1  ;;  %s390_s29 = sshll.u32 %s633_s2, 4  ;;  %s392_s5 = sshll.u32 %s733_s3, 4  ;;  %s391_s29 = int_to_ptr.vmem [resolvable:$true] %s390_s29  ;;  %s393_s5 = int_to_ptr.hbm [resolvable:$true] %s392_s5 }
  0x1c   :  { %193 = vmatpush.bf16.msra.mxu0 %v453_v22  ;;  %496 = vmatpush.bf16.msra.mxu2 %v453_v22 }
  0x1e   :  { %212 = vmatpush.bf16.msra.mxu1 %v449_v19  ;;  %505 = vmatpush.bf16.msra.mxu3 %v449_v19 }
  0x20   :  { %194 = vmatpush.bf16.msra.mxu0 %v445_v28  ;;  %497 = vmatpush.bf16.msra.mxu2 %v445_v28 }
  0x22   :  { %213 = vmatpush.bf16.msra.mxu1 %v441_v25  ;;  %506 = vmatpush.bf16.msra.mxu3 %v441_v25 }
  0x24   :  { %195 = vmatpush.bf16.msra.mxu0 %v437_v34  ;;  %498 = vmatpush.bf16.msra.mxu2 %v437_v34 }
  0x26   :  { %214 = vmatpush.bf16.msra.mxu1 %v433_v31  ;;  %507 = vmatpush.bf16.msra.mxu3 %v433_v31 }
  0x28   :  { %196 = vmatpush.bf16.msra.mxu0 %v429_v41  ;;  %499 = vmatpush.bf16.msra.mxu2 %v429_v41 }
  0x2a   :  { %215 = vmatpush.bf16.msra.mxu1 %v425_v37  ;;  %508 = vmatpush.bf16.msra.mxu3 %v425_v37 }
  0x2c   :  { %197 = vmatpush.bf16.msra.mxu0 %v421_v46  ;;  %500 = vmatpush.bf16.msra.mxu2 %v421_v46 }
  0x2e   :  { %216 = vmatpush.bf16.msra.mxu1 %v417_v45  ;;  %509 = vmatpush.bf16.msra.mxu3 %v417_v45 }
  0x30   :  { %198 = vmatpush.bf16.msra.mxu0 %v413_v51  ;;  %501 = vmatpush.bf16.msra.mxu2 %v413_v51 }
  0x31   :  { %217 = vmatmul.bf16.vlgmr.msra.gmra.mxu1 %v477_v47  ;;  %222 = vmatmul.bf16.vlgmr.msra.gmra.mxu3 %v108_v48 }
  0x33   :  { %199 = vmatmul.bf16.vlgmr.msra.gmra.mxu0 %v477_v47  ;;  %204 = vmatmul.bf16.vlgmr.msra.gmra.mxu2 %v108_v48 }
  0xae   :  { %v218_v54 = vpop.f32.mrf.mxu1 }
  0xaf   :  { %v669_v55 = vadd.f32 %v218_v54, %v67_v53 }
  0xb1   :  { %v672_v56 = vmul.f32 0.70710677, %v669_v55 }
  0xb3   :  { %v254_v57 = vmul.f32 %v672_v56, %v672_v56 }
  0xb4   :  { %v223_v58 = vpop.f32.mrf.mxu3 }
  0xb5   :  { %v255_v59 = vmin.f32 %v254_v57, 16.0  ;;  %v676_v60 = vadd.f32 %v223_v58, %v67_v53 }
  0xb6   :  { %v220_v61 = vpop.f32.mrf.mxu1  ;;  %v701_v33 = vpop.f32.mrf.mxu2 }
  0xb7   :  { %v256_v62 = vmul.f32 2.1237322e-06, %v255_v59  ;;  %v267_v63 = vmul.f32 3.8918573e-05, %v255_v59  ;;  %v678_v0 = vadd.f32 %v220_v61, %v67_v53  ;;  %v681_v1 = vmul.f32 0.70710677, %v676_v60 }
  0xb9   :  { %v257_v2 = vadd.f32 0.00028619796, %v256_v62  ;;  %v268_v3 = vadd.f32 0.001143296, %v267_v63  ;;  %v334_v4 = vmul.f32 %v681_v1, %v681_v1  ;;  %v686_v5 = vmul.f32 0.70710677, %v678_v0 }
  0xbb   :  { %v258_v6 = vmul.f32 %v257_v2, %v255_v59  ;;  %v269_v7 = vmul.f32 %v268_v3, %v255_v59  ;;  %v688_v8 = vmin.f32 %v334_v4, 16.0  ;;  %v294_v9 = vmul.f32 %v686_v5, %v686_v5 }
  0xbc   :  { %v225_v10 = vpop.f32.mrf.mxu3 }
  0xbd   :  { %v259_v11 = vadd.f32 0.0036580483, %v258_v6  ;;  %v270_v12 = vadd.f32 0.014752088, %v269_v7  ;;  %v336_v13 = vmul.f32 2.1237322e-06, %v688_v8 }
  0xbe   :  { %v347_v14 = vmul.f32 3.8918573e-05, %v688_v8  ;;  %v694_v15 = vmin.f32 %v294_v9, 16.0  ;;  %v207_v49 = vpop.f32.mrf.mxu2 }
  0xbf   :  { %v271_v16 = vmul.f32 %v270_v12, %v255_v59  ;;  %v260_v17 = vmul.f32 %v259_v11, %v255_v59  ;;  %v337_v18 = vadd.f32 0.00028619796, %v336_v13  ;;  %v250_v49 = vmul.f32 0.5, %v676_v60 }
  0xc0   :  { %v348_v19 = vadd.f32 0.001143296, %v347_v14  ;;  %v296_v20 = vmul.f32 2.1237322e-06, %v694_v15  ;;  %v307_v22 = vmul.f32 3.8918573e-05, %v694_v15 }
  0xc1   :  { %v272_v21 = vadd.f32 0.112945676, %v271_v16  ;;  %v338_v23 = vmul.f32 %v337_v18, %v688_v8  ;;  %v261_v28 = vadd.f32 0.05243302, %v260_v17 }
  0xc2   :  { %v349_v24 = vmul.f32 %v348_v19, %v688_v8  ;;  %v297_v25 = vadd.f32 0.00028619796, %v296_v20  ;;  %v308_v27 = vadd.f32 0.001143296, %v307_v22 }
  0xc3   :  { %v273_v26 = vmul.f32 %v272_v21, %v255_v59  ;;  %v339_v31 = vadd.f32 0.0036580483, %v338_v23  ;;  %v262_v38 = vmul.f32 %v261_v28, %v255_v59 }
  0xc4   :  { %v350_v29 = vadd.f32 0.014752088, %v349_v24  ;;  %v309_v32 = vmul.f32 %v308_v27, %v694_v15  ;;  %v298_v35 = vmul.f32 %v297_v25, %v694_v15 }
  0xc5   :  { %v274_v30 = vadd.f32 0.4994258, %v273_v26  ;;  %v340_v41 = vmul.f32 %v339_v31, %v688_v8  ;;  %v263_v45 = vadd.f32 0.18741608, %v262_v38  ;;  %v66_v26 = vperm.slane %v666_v52, 0 }
  0xc6   :  { %v351_v34 = vmul.f32 %v350_v29, %v688_v8  ;;  %v310_v37 = vadd.f32 0.014752088, %v309_v32  ;;  %v299_v44 = vadd.f32 0.0036580483, %v298_v35  ;;  %v248_v35 = vmul.f32 0.5, %v669_v55 }
  0xc7   :  { %v275_v36 = vmul.f32 %v274_v30, %v255_v59  ;;  %v341_v47 = vadd.f32 0.05243302, %v340_v41  ;;  %v264_v54 = vmul.f32 %v263_v45, %v255_v59 }
  0xc8   :  { %v352_v39 = vadd.f32 0.112945676, %v351_v34  ;;  %v311_v42 = vmul.f32 %v310_v37, %v694_v15  ;;  %v300_v51 = vmul.f32 %v299_v44, %v694_v15  ;;  %v200_v34 = vpop.f32.mrf.mxu0 }
  0xc9   :  { %v276_v40 = vadd.f32 1.0, %v275_v36  ;;  %v342_v61 = vmul.f32 %v341_v47, %v688_v8  ;;  %v265_v3 = vadd.f32 1.1283791, %v264_v54  ;;  %v227_v37 = vadd.f32 %v200_v34, %v66_v26 }
  0xca   :  { %v353_v43 = vmul.f32 %v352_v39, %v688_v8  ;;  %v312_v48 = vadd.f32 0.112945676, %v311_v42  ;;  %v301_v2 = vadd.f32 0.05243302, %v300_v51 }
  0xcb   :  { %518 = vrcp.f32 %v276_v40  ;;  %v286_v7 = vand.u32 2147483647, %v276_v40  ;;  %v288_v9 = vand.u32 2147483648, %v276_v40  ;;  %v343_v10 = vadd.f32 0.18741608, %v342_v61 }
  0xcc   :  { %v354_v46 = vadd.f32 0.4994258, %v353_v43  ;;  %v313_v53 = vmul.f32 %v312_v48, %v694_v15  ;;  %v302_v12 = vmul.f32 %v301_v2, %v694_v15  ;;  %vm282_vm1 = vweird.f32 %v276_v40 }
  0xcd   :  { %v289_v16 = vor.u32 1.1754944e-38, %v288_v9  ;;  %v344_v17 = vmul.f32 %v343_v10, %v688_v8  ;;  %v266_v19 = vmul.f32 %v265_v3, %v672_v56  ;;  %vm287_vm3 = vcmp.eq.f32.partialorder %v286_v7, 8.507059e+37 }
  0xce   :  { %v355_v50 = vmul.f32 %v354_v46, %v688_v8  ;;  %v314_v62 = vadd.f32 0.4994258, %v313_v53  ;;  %v303_v21 = vadd.f32 0.18741608, %v302_v12  ;;  %v249_v3 = vmul.f32 0.5, %v678_v0 }
  0xcf   :  { %v345_v27 = vadd.f32 1.1283791, %v344_v17 }
  0xd0   :  { %v356_v57 = vadd.f32 1.0, %v355_v50  ;;  %v315_v6 = vmul.f32 %v314_v62, %v694_v15  ;;  %v304_v31 = vmul.f32 %v303_v21, %v694_v15  ;;  %v202_v2 = vpop.f32.mrf.mxu0 }
  0xd1   :  { %v519_v58 = vpop.eup %518  ;;  %v346_v52 = vmul.f32 %v345_v27, %v681_v1  ;;  %v231_v1 = vadd.f32 %v701_v33, %v66_v26 }
  0xd2   :  { %v278_v63 = vmul.f32 %v519_v58, %v276_v40  ;;  %520 = vrcp.f32 %v356_v57  ;;  %vm283_vm0 = vweird.f32 %v519_v58  ;;  %v316_v59 = vadd.f32 1.0, %v315_v6 }
  0xd3   :  { %vm284_vm2 = vmor %vm282_vm1, %vm283_vm0  ;;  %v368_v25 = vand.u32 2147483648, %v356_v57  ;;  %v366_v29 = vand.u32 2147483647, %v356_v57  ;;  %vm362_vm5 = vweird.f32 %v356_v57  ;;  %v305_v42 = vadd.f32 1.1283791, %v304_v31 }
  0xd4   :  { %v279_v4 = vsub.f32 1.0, %v278_v63  ;;  %522 = vrcp.f32 %v316_v59  ;;  %v328_v43 = vand.u32 2147483648, %v316_v59  ;;  %v326_v46 = vand.u32 2147483647, %v316_v59 }
  0xd5   :  { %v369_v36 = vor.u32 1.1754944e-38, %v368_v25  ;;  %vm367_vm7 = vcmp.eq.f32.partialorder %v366_v29, 8.507059e+37  ;;  %vm322_vm9 = vweird.f32 %v316_v59  ;;  %v306_v51 = vmul.f32 %v305_v42, %v686_v5 }
  0xd6   :  { %v280_v11 = vmul.f32 %v519_v58, %v279_v4  ;;  %v329_v50 = vor.u32 1.1754944e-38, %v328_v43  ;;  %vm327_vm11 = vcmp.eq.f32.partialorder %v326_v46, 8.507059e+37  ;;  %v229_v5 = vadd.f32 %v202_v2, %v66_v26 }
  0xd8   :  { %v521_v13 = vpop.eup %520  ;;  %v281_v14 = vadd.f32 %v519_v58, %v280_v11 }
  0xd9   :  { %v358_v18 = vmul.f32 %v521_v13, %v356_v57  ;;  %vm363_vm4 = vweird.f32 %v521_v13 }
  0xda   :  { %v285_v20 = vsel %vm284_vm2, %v519_v58, %v281_v14  ;;  %v523_v30 = vpop.eup %522  ;;  %vm364_vm6 = vmor %vm362_vm5, %vm363_vm4 }
  0xdb   :  { %v290_v22 = vsel %vm287_vm3, %v289_v16, %v285_v20  ;;  %v359_v23 = vsub.f32 1.0, %v358_v18  ;;  %v318_v56 = vmul.f32 %v523_v30, %v316_v59  ;;  %vm323_vm8 = vweird.f32 %v523_v30 }
  0xdc   :  { %v291_v24 = vmul.f32 %v290_v22, %v266_v19  ;;  %vm324_vm10 = vmor %vm322_vm9, %vm323_vm8 }
  0xdd   :  { %v360_v28 = vmul.f32 %v521_v13, %v359_v23  ;;  %v319_v40 = vsub.f32 1.0, %v318_v56 }
  0xde   :  { %v474_v8 = vclamps-f32 %v291_v24, 1.0 }
  0xdf   :  { %v361_v32 = vadd.f32 %v521_v13, %v360_v28  ;;  %v320_v45 = vmul.f32 %v523_v30, %v319_v40 }
  0xe0   :  { %v374_v38 = vadd.f32 1.0, %v474_v8 }
  0xe1   :  { %v365_v39 = vsel %vm364_vm6, %v521_v13, %v361_v32  ;;  %v321_v48 = vadd.f32 %v523_v30, %v320_v45 }
  0xe2   :  { %v370_v41 = vsel %vm367_vm7, %v369_v36, %v365_v39  ;;  %v377_v15 = vmul.f32 %v374_v38, %v248_v35 }
  0xe3   :  { %v371_v44 = vmul.f32 %v370_v41, %v346_v52  ;;  %v325_v53 = vsel %vm324_vm10, %v523_v30, %v321_v48 }
  0xe4   :  { %v380_v47 = vmul.f32 %v377_v15, %v227_v37  ;;  %v330_v57 = vsel %vm327_vm11, %v329_v50, %v325_v53 }
  0xe5   :  { %v476_v55 = vclamps-f32 %v371_v44, 1.0  ;;  %v331_v58 = vmul.f32 %v330_v57, %v306_v51 }
  0xe6   :  { %383 = vst [vmem:[#allocation9] sm:$0xff] %v380_v47 }
  0xe7   :  { %v376_v54 = vadd.f32 1.0, %v476_v55  ;;  %v475_v63 = vclamps-f32 %v331_v58, 1.0 }
  0xe9   :  { %v379_v61 = vmul.f32 %v376_v54, %v250_v49  ;;  %v375_v60 = vadd.f32 1.0, %v475_v63 }
  0xeb   :  { %v382_v62 = vmul.f32 %v379_v61, %v231_v1  ;;  %v378_v33 = vmul.f32 %v375_v60, %v249_v3 }
  0xed   :  { %385 = vst [vmem:[#allocation9 + $0x10] sm:$0xff] %v382_v62  ;;  %v381_v4 = vmul.f32 %v378_v33, %v229_v5 }
  0xef   :  { %384 = vst [vmem:[#allocation9 + $0x8] sm:$0xff] %v381_v4 }
  0xf0   :  { %398 = dma.vmem_to_hbm [thread:$0]  %s391_s29, 384, %s393_s5, [#allocation5], %s627_s20, %s627_s20, %s628_s21  }
  0xf1   :  { %624 = dma.done.wait [#allocation5], 384  }
  0xf2   :  { %625 = vsyncadd [#allocation5], 4294966912 }
  0xf3   :  { %403 = vsyncpa [#allocation4], 1 }
  0xf4   :  { %404 = vsyncpa [#allocation7], 1 }
  0xf5   :  { %405 = vsyncpa [#allocation5], 1 }

</bundles_post_ra>
